<compile_context>
chip_gen: v6e
topology: v6e:2x2x1
jax: 0.10.0
libtpu: 0.0.40
codegen_flags: <defaults>
</compile_context>

<pallas_src>
import functools

import jax
import jax.numpy as jnp
from jax.experimental import pallas as pl
from jax.experimental.pallas import tpu as pltpu

_LANE = 128
_SUB = 8


def _poly1_math(x, y, w, pw, *, epsilon, alpha, gamma, approx_recip):
    """Poly-1 focal loss math on f32 logits x and bool one-hot y."""
    e = jnp.exp(-jnp.abs(x))                       # shared: sigmoid + softplus
    one_p_e = 1.0 + e
    if approx_recip:
        inv = pl.reciprocal(one_p_e, approx=True)  # EUP slot (validate tol)
    else:
        inv = 1.0 / one_p_e
    q = e * inv                                    # = min(p, 1-p)
    sp_pos = jnp.maximum(x, 0.0) + jnp.log1p(e)    # softplus(x)  = -log(1-p)
    yf = y.astype(x.dtype)

    # binary_cross_entropy_with_logits(reduction='none', weight, pos_weight)
    if pw is not None:
        sp_neg = sp_pos - x                        # softplus(-x) = -log(p)
        ce = jnp.where(y, pw * sp_neg, sp_pos)
    else:
        ce = sp_pos - x * yf                       # merged select
    if w is not None:
        ce = ce * w

    # 1 - pt where pt = y*p + (1-y)*(1-p); merged select on (y, sign(x))
    one_m_pt = jnp.where(y == (x >= 0), q, inv)

    if gamma == 2.0:                               # default: pure VPU
        pow_g = one_m_pt * one_m_pt
    elif gamma == 1.0:
        pow_g = one_m_pt
    elif gamma == 0.0:
        pow_g = jnp.ones_like(one_m_pt)
    else:
        pow_g = jnp.power(one_m_pt, gamma)

    fl = ce * pow_g
    if alpha >= 0:
        fl = fl * jnp.where(y, alpha, 1.0 - alpha)
    # (1-pt)^(gamma+1) = (1-pt)^gamma * (1-pt): reuse pow_g, no extra pow
    return fl + epsilon * (pow_g * one_m_pt)


def _poly1_focal_kernel(*refs, epsilon, alpha, gamma, has_w, has_pw,
                        reduce_out, mask_axis, mask_grid_axis, mask_extent,
                        approx_recip):
    """One tile.  The class index lives on axis 1 of the logits block."""
    idx = 0
    logits_ref = refs[idx]; idx += 1
    labels_ref = refs[idx]; idx += 1
    w_ref = None
    pw_ref = None
    if has_w:
        w_ref = refs[idx]; idx += 1
    if has_pw:
        pw_ref = refs[idx]; idx += 1
    out_ref = refs[idx]

    x = logits_ref[...].astype(jnp.float32)
    lab = labels_ref[...]                                   # int32, size-1 class axis
    cls = jax.lax.broadcasted_iota(jnp.int32, x.shape, 1)   # class ids on axis 1
    y = cls == lab                                          # one-hot (bool)

    w = w_ref[...].astype(jnp.float32) if has_w else None
    pw = pw_ref[...].astype(jnp.float32) if has_pw else None

    poly1 = _poly1_math(x, y, w, pw, epsilon=epsilon, alpha=alpha, gamma=gamma,
                        approx_recip=approx_recip)

    if not reduce_out:
        # OOB lanes of the edge block are simply discarded by Pallas on store.
        out_ref[...] = poly1.astype(out_ref.dtype)
    else:
        # Mask the edge-block overhang along the tiled axis, then emit one
        # partial sum per block into lane 0 of a small lane-dense output block.
        tile = x.shape[mask_axis]
        pos = (pl.program_id(mask_grid_axis) * tile
               + jax.lax.broadcasted_iota(jnp.int32, x.shape, mask_axis))
        psum = jnp.sum(jnp.where(pos < mask_extent, poly1, 0.0))
        lane = jax.lax.broadcasted_iota(jnp.int32, out_ref.shape, out_ref.ndim - 1)
        out_ref[...] = jnp.where(lane == 0, psum, 0.0)


def _compiler_params(grid_len, vmem_limit_bytes):
    return pltpu.CompilerParams(
        dimension_semantics=("parallel",) * grid_len,
        vmem_limit_bytes=vmem_limit_bytes)


def _run_sublane(x3, lab2, *, weight, pos_weight, epsilon, alpha, gamma,
                 reduce_out, target_tile_bytes, approx_reciprocal,
                 vmem_limit_bytes):
    """Class-on-sublanes layout: x3 = [N, C, S], lab2 = [N, S] class ids."""
    n, c, s = x3.shape
    lab2 = lab2.astype(jnp.int32)
    itemsize = max(x3.dtype.itemsize, 4)           # labels are int32
    dense = (s % _LANE == 0)

    if dense:
        # [N, C, S] -> [N, C, rows, 128] (free reshape): lane/sublane dense
        rows = s // _LANE
        budget_rows = max(1, target_tile_bytes // (c * _LANE * itemsize))
        if rows <= _SUB or budget_rows >= rows:
            tile_rows = rows                       # == full dim -> compliant
        else:
            tile_rows = max(_SUB, (budget_rows // _SUB) * _SUB)
        grid_s = pl.cdiv(rows, tile_rows)
        if n * grid_s < 2 and rows > _SUB:
            # give v7x's second TensorCore something to do
            tile_rows = max(_SUB, ((pl.cdiv(rows, 2) + _SUB - 1) // _SUB) * _SUB)
            grid_s = pl.cdiv(rows, tile_rows)
        x_in = x3.reshape(n, c, rows, _LANE)
        lab_in = lab2.reshape(n, 1, rows, _LANE)
        in_specs = [
            pl.BlockSpec((1, c, tile_rows, _LANE), lambda i, j: (i, 0, j, 0)),
            pl.BlockSpec((1, 1, tile_rows, _LANE), lambda i, j: (i, 0, j, 0)),
        ]
        w_shape = (1, c, 1, 1)
        mask_extent = rows
    else:
        # fallback: spatial on lanes, C on sublanes (padded to 8 if C < 8)
        c_pad = ((c + _SUB - 1) // _SUB) * _SUB    # honest VMEM budget
        budget_s = max(_LANE,
                       (target_tile_bytes // (c_pad * itemsize)) // _LANE * _LANE)
        tile_s = s if budget_s >= s else budget_s
        grid_s = pl.cdiv(s, tile_s)
        if n * grid_s < 2 and s > _LANE:
            tile_s = max(_LANE, ((pl.cdiv(s, 2) + _LANE - 1) // _LANE) * _LANE)
            grid_s = pl.cdiv(s, tile_s)
        x_in = x3
        lab_in = lab2.reshape(n, 1, s)
        in_specs = [
            pl.BlockSpec((1, c, tile_s), lambda i, j: (i, 0, j)),
            pl.BlockSpec((1, 1, tile_s), lambda i, j: (i, 0, j)),
        ]
        w_shape = (1, c, 1)
        mask_extent = s

    inputs = [x_in, lab_in]
    if weight is not None:
        inputs.append(jnp.asarray(weight, jnp.float32).reshape(w_shape))
        in_specs.append(pl.BlockSpec(w_shape, lambda i, j: (0,) * len(w_shape)))
    if pos_weight is not None:
        inputs.append(jnp.asarray(pos_weight, jnp.float32).reshape(w_shape))
        in_specs.append(pl.BlockSpec(w_shape, lambda i, j: (0,) * len(w_shape)))

    if reduce_out:
        out_shape = jax.ShapeDtypeStruct((n, grid_s, 1, _LANE), jnp.float32)
        out_spec = pl.BlockSpec((1, 1, 1, _LANE), lambda i, j: (i, j, 0, 0))
    elif dense:
        out_shape = jax.ShapeDtypeStruct(x_in.shape, x3.dtype)
        out_spec = pl.BlockSpec((1, c, tile_rows, _LANE), lambda i, j: (i, 0, j, 0))
    else:
        out_shape = jax.ShapeDtypeStruct((n, c, s), x3.dtype)
        out_spec = pl.BlockSpec((1, c, tile_s), lambda i, j: (i, 0, j))

    kernel = functools.partial(
        _poly1_focal_kernel,
        epsilon=float(epsilon), alpha=float(alpha), gamma=float(gamma),
        has_w=weight is not None, has_pw=pos_weight is not None,
        reduce_out=reduce_out, mask_axis=2, mask_grid_axis=1,
        mask_extent=mask_extent, approx_recip=approx_reciprocal)

    elems = n * c * s
    out_bytes = n * grid_s * _LANE * 4 if reduce_out else elems * x3.dtype.itemsize
    cost = pl.CostEstimate(
        flops=22 * elems, transcendentals=2 * elems,
        bytes_accessed=elems * x3.dtype.itemsize + n * s * 4 + out_bytes)

    out = pl.pallas_call(
        kernel,
        out_shape=out_shape,
        grid_spec=pltpu.PrefetchScalarGridSpec(
            num_scalar_prefetch=0, grid=(n, grid_s),
            in_specs=in_specs, out_specs=out_spec),
        compiler_params=_compiler_params(2, vmem_limit_bytes),
        cost_estimate=cost,
    )(*inputs)

    if reduce_out:
        return out                                 # per-block partial sums
    if dense:
        return out.reshape(n, c, s)
    return out


def _run_lanemajor(x2, lab1, *, weight, pos_weight, epsilon, alpha, gamma,
                   reduce_out, target_tile_bytes, approx_reciprocal,
                   vmem_limit_bytes):
    """Class-on-lanes layout for 2-D [N, C] logits with C % 128 == 0."""
    n, c = x2.shape
    lab = lab1.astype(jnp.int32).reshape(n, 1)
    itemsize = max(x2.dtype.itemsize, 4)
    budget_rows = max(_SUB, (target_tile_bytes // (c * itemsize)) // _SUB * _SUB)
    tile_n = n if budget_rows >= n else budget_rows
    grid_n = pl.cdiv(n, tile_n)
    if grid_n < 2 and n > _SUB:
        tile_n = max(_SUB, ((pl.cdiv(n, 2) + _SUB - 1) // _SUB) * _SUB)
        grid_n = pl.cdiv(n, tile_n)

    in_specs = [
        pl.BlockSpec((tile_n, c), lambda i: (i, 0)),
        pl.BlockSpec((tile_n, 1), lambda i: (i, 0)),
    ]
    inputs = [x2, lab]
    if weight is not None:
        inputs.append(jnp.asarray(weight, jnp.float32).reshape(1, c))
        in_specs.append(pl.BlockSpec((1, c), lambda i: (0, 0)))
    if pos_weight is not None:
        inputs.append(jnp.asarray(pos_weight, jnp.float32).reshape(1, c))
        in_specs.append(pl.BlockSpec((1, c), lambda i: (0, 0)))

    if reduce_out:
        out_shape = jax.ShapeDtypeStruct((grid_n, 1, _LANE), jnp.float32)
        out_spec = pl.BlockSpec((1, 1, _LANE), lambda i: (i, 0, 0))
    else:
        out_shape = jax.ShapeDtypeStruct((n, c), x2.dtype)
        out_spec = pl.BlockSpec((tile_n, c), lambda i: (i, 0))

    kernel = functools.partial(
        _poly1_focal_kernel,
        epsilon=float(epsilon), alpha=float(alpha), gamma=float(gamma),
        has_w=weight is not None, has_pw=pos_weight is not None,
        reduce_out=reduce_out, mask_axis=0, mask_grid_axis=0,
        mask_extent=n, approx_recip=approx_reciprocal)

    elems = n * c
    out_bytes = grid_n * _LANE * 4 if reduce_out else elems * x2.dtype.itemsize
    cost = pl.CostEstimate(
        flops=22 * elems, transcendentals=2 * elems,
        bytes_accessed=elems * x2.dtype.itemsize + n * 4 + out_bytes)

    return pl.pallas_call(
        kernel,
        out_shape=out_shape,
        grid_spec=pltpu.PrefetchScalarGridSpec(
            num_scalar_prefetch=0, grid=(grid_n,),
            in_specs=in_specs, out_specs=out_spec),
        compiler_params=_compiler_params(1, vmem_limit_bytes),
        cost_estimate=cost,
    )(*inputs)


def poly1_focal_loss(logits, labels, *, num_classes, epsilon=1.0, alpha=0.25,
                     gamma=2.0, reduction="none", weight=None, pos_weight=None,
                     label_is_onehot=False, target_tile_bytes=2 * 1024 * 1024,
                     approx_reciprocal=False,
                     vmem_limit_bytes=32 * 1024 * 1024):
    """JAX/Pallas equivalent of Poly1FocalLoss.forward (label_is_onehot=False)."""
    if label_is_onehot:
        # TODO(synk): one-hot / soft-label target path not implemented.
        raise NotImplementedError("label_is_onehot=True path not implemented")

    orig_shape = logits.shape
    c = orig_shape[1]
    assert c == num_classes, "logits channel dim must equal num_classes"
    reduce_out = reduction in ("mean", "sum")

    common = dict(weight=weight, pos_weight=pos_weight, epsilon=epsilon,
                  alpha=alpha, gamma=gamma, reduce_out=reduce_out,
                  target_tile_bytes=target_tile_bytes,
                  approx_reciprocal=approx_reciprocal,
                  vmem_limit_bytes=vmem_limit_bytes)

    if logits.ndim == 2:
        if c % _LANE == 0:
            # native layout (N on sublanes, C on lanes): no transpose copies
            res = _run_lanemajor(logits, labels, **common)
            loss = None if reduce_out else res
        else:
            # small C: tiny transpose to [1, C, N], class-on-sublane kernel
            x3 = jnp.transpose(logits, (1, 0))[None]
            lab2 = labels.reshape(1, -1)
            res = _run_sublane(x3, lab2, **common)
            loss = None if reduce_out else jnp.transpose(res[0], (1, 0))
    else:
        # [N, C, *spatial] -> [N, C, S]: free, contiguous reshape
        n0 = orig_shape[0]
        s0 = 1
        for d in orig_shape[2:]:
            s0 *= d
        x3 = logits.reshape(n0, c, s0)
        lab2 = labels.reshape(n0, s0)
        res = _run_sublane(x3, lab2, **common)
        loss = None if reduce_out else res.reshape(orig_shape)

    if reduction == "mean":
        return (res.sum() / logits.size).astype(logits.dtype)
    if reduction == "sum":
        return res.sum().astype(logits.dtype)
    return loss


def _reference_loss(logits, labels, num_classes, epsilon=1.0, alpha=0.25,
                    gamma=2.0, weight=None, pos_weight=None):
    """Pure-JAX reference mirroring the PyTorch forward (reduction='none')."""
    x = logits.astype(jnp.float32)
    y = jax.nn.one_hot(labels, num_classes, axis=1, dtype=jnp.float32)
    log_p = jax.nn.log_sigmoid(x)
    log_1mp = jax.nn.log_sigmoid(-x)
    bshape = (1, num_classes) + (1,) * (logits.ndim - 2)
    pw = 1.0 if pos_weight is None else jnp.asarray(pos_weight, jnp.float32).reshape(bshape)
    ce = -(pw * y * log_p + (1.0 - y) * log_1mp)
    if weight is not None:
        ce = ce * jnp.asarray(weight, jnp.float32).reshape(bshape)
    p = jax.nn.sigmoid(x)
    pt = y * p + (1.0 - y) * (1.0 - p)
    fl = ce * (1.0 - pt) ** gamma
    if alpha >= 0:
        fl = (alpha * y + (1.0 - alpha) * (1.0 - y)) * fl
    return fl + epsilon * (1.0 - pt) ** (gamma + 1.0)


if __name__ == "__main__":
    key = jax.random.PRNGKey(0)
    ks = jax.random.split(key, 10)

    # 1) 4-D NCHW, S % 128 == 0 -> dense (1, C, rows, 128) layout, 'none'
    N, C, H, W = 2, 4, 16, 16
    logits = jax.random.normal(ks[0], (N, C, H, W), dtype=jnp.float32)
    labels = jax.random.randint(ks[1], (N, H, W), 0, C, dtype=jnp.int32)
    loss = jax.block_until_ready(poly1_focal_loss(logits, labels, num_classes=C))
    ref = _reference_loss(logits, labels, C)
    assert loss.shape == logits.shape
    assert jnp.allclose(loss, ref, atol=1e-5, rtol=1e-5), "4D 'none' mismatch"

    # 2) same inputs, fused in-kernel reduction ('mean')
    lm = jax.block_until_ready(
        poly1_focal_loss(logits, labels, num_classes=C, reduction="mean"))
    assert jnp.allclose(lm, ref.mean(), atol=1e-5, rtol=1e-5), "4D 'mean' mismatch"

    # 3) per-class weight / pos_weight
    wv = jnp.linspace(0.5, 1.5, C, dtype=jnp.float32)
    pwv = jnp.linspace(1.0, 2.0, C, dtype=jnp.float32)
    lw = jax.block_until_ready(
        poly1_focal_loss(logits, labels, num_classes=C, weight=wv, pos_weight=pwv))
    refw = _reference_loss(logits, labels, C, weight=wv, pos_weight=pwv)
    assert jnp.allclose(lw, refw, atol=1e-5, rtol=1e-5), "weight/pos_weight mismatch"

    # 4) dense layout with a partial edge block (rows=10, forced tile_rows=8)
    logits4 = jax.random.normal(ks[2], (1, C, 40, 32), dtype=jnp.float32)
    labels4 = jax.random.randint(ks[3], (1, 40, 32), 0, C, dtype=jnp.int32)
    ref4 = _reference_loss(logits4, labels4, C)
    l4 = jax.block_until_ready(poly1_focal_loss(
        logits4, labels4, num_classes=C, target_tile_bytes=4096))
    assert jnp.allclose(l4, ref4, atol=1e-5, rtol=1e-5), "4D edge-block mismatch"
    l4s = jax.block_until_ready(poly1_focal_loss(
        logits4, labels4, num_classes=C, reduction="sum", target_tile_bytes=4096))
    assert jnp.allclose(l4s, ref4.sum(), atol=1e-3, rtol=1e-5), "4D edge 'sum' mismatch"

    # 5) S % 128 != 0 -> 3-D fallback layout with a partial edge block
    logits5 = jax.random.normal(ks[4], (2, C, 17, 19), dtype=jnp.float32)
    labels5 = jax.random.randint(ks[5], (2, 17, 19), 0, C, dtype=jnp.int32)
    ref5 = _reference_loss(logits5, labels5, C)
    l5 = jax.block_until_ready(poly1_focal_loss(
        logits5, labels5, num_classes=C, target_tile_bytes=4096))
    assert jnp.allclose(l5, ref5, atol=1e-5, rtol=1e-5), "3D fallback mismatch"
    l5s = jax.block_until_ready(poly1_focal_loss(
        logits5, labels5, num_classes=C, reduction="sum", target_tile_bytes=4096))
    assert jnp.allclose(l5s, ref5.sum(), atol=1e-3, rtol=1e-5), "3D 'sum' mismatch"

    # 6) 2-D [N, C], small C -> transpose path
    logits6 = jax.random.normal(ks[6], (8, C), dtype=jnp.float32)
    labels6 = jax.random.randint(ks[7], (8,), 0, C, dtype=jnp.int32)
    l6 = jax.block_until_ready(poly1_focal_loss(logits6, labels6, num_classes=C))
    ref6 = _reference_loss(logits6, labels6, C)
    assert l6.shape == logits6.shape
    assert jnp.allclose(l6, ref6, atol=1e-5, rtol=1e-5), "2D small-C mismatch"

    # 7) 2-D [N, C] with C % 128 == 0 -> native lane-major path (no transpose)
    C7, N7 = 128, 10
    logits7 = jax.random.normal(ks[8], (N7, C7), dtype=jnp.float32)
    labels7 = jax.random.randint(ks[9], (N7,), 0, C7, dtype=jnp.int32)
    ref7 = _reference_loss(logits7, labels7, C7)
    l7 = jax.block_until_ready(poly1_focal_loss(logits7, labels7, num_classes=C7))
    assert jnp.allclose(l7, ref7, atol=1e-5, rtol=1e-5), "2D lane-major mismatch"
    l7m = jax.block_until_ready(
        poly1_focal_loss(logits7, labels7, num_classes=C7, reduction="mean"))
    assert jnp.allclose(l7m, ref7.mean(), atol=1e-5, rtol=1e-5), \
        "2D lane-major 'mean' mismatch"

    print("KERNEL_OK")
</pallas_src>

<mosaic_0001>
module attributes {stable_mosaic.version = 11 : i64} {
  func.func @_poly1_focal_kernel(%arg0: i32, %arg1: i32, %arg2: memref<1x4x2x128xf32, #tpu.memory_space<vmem>>, %arg3: memref<1x1x2x128xi32, #tpu.memory_space<vmem>>, %arg4: memref<1x4x2x128xf32, #tpu.memory_space<vmem>>) attributes {dimension_semantics = [#tpu.dimension_semantics<parallel>, #tpu.dimension_semantics<parallel>], iteration_bounds = array<i64: 2, 1>, scalar_prefetch = 0 : i64, scratch_operands = 0 : i64, tpu.core_type = #tpu.core_type<tc>, window_params = [{transform_indices = @transform_0, window_bounds = array<i64: 1, 4, 2, 128>}, {transform_indices = @transform_1, window_bounds = array<i64: 1, 1, 2, 128>}, {transform_indices = @transform_2, window_bounds = array<i64: 1, 4, 2, 128>}]} {
    %c0 = arith.constant 0 : index
    %c0_0 = arith.constant 0 : index
    %c0_1 = arith.constant 0 : index
    %c0_2 = arith.constant 0 : index
    %0 = vector.load %arg2[%c0, %c0_0, %c0_1, %c0_2] : memref<1x4x2x128xf32, #tpu.memory_space<vmem>>, vector<1x4x2x128xf32>
    %c0_3 = arith.constant 0 : index
    %c0_4 = arith.constant 0 : index
    %c0_5 = arith.constant 0 : index
    %c0_6 = arith.constant 0 : index
    %1 = vector.load %arg3[%c0_3, %c0_4, %c0_5, %c0_6] : memref<1x1x2x128xi32, #tpu.memory_space<vmem>>, vector<1x1x2x128xi32>
    %2 = tpu.iota {dimensions = array<i32: 1>} : vector<1x4x2x128xi32>
    %3 = vector.broadcast %1 : vector<1x1x2x128xi32> to vector<1x4x2x128xi32>
    %4 = arith.cmpi eq, %2, %3 : vector<1x4x2x128xi32>
    %5 = math.absf %0 : vector<1x4x2x128xf32>
    %cst = arith.constant 0.000000e+00 : f32
    %6 = vector.broadcast %cst : f32 to vector<1x4x2x128xf32>
    %7 = arith.subf %6, %5 : vector<1x4x2x128xf32>
    %8 = math.exp %7 : vector<1x4x2x128xf32>
    %cst_7 = arith.constant 1.000000e+00 : f32
    %9 = vector.broadcast %cst_7 : f32 to vector<1x4x2x128xf32>
    %10 = arith.addf %9, %8 : vector<1x4x2x128xf32>
    %cst_8 = arith.constant 1.000000e+00 : f32
    %11 = vector.broadcast %cst_8 : f32 to vector<1x4x2x128xf32>
    %12 = arith.divf %11, %10 : vector<1x4x2x128xf32>
    %13 = arith.mulf %8, %12 : vector<1x4x2x128xf32>
    %cst_9 = arith.constant 0.000000e+00 : f32
    %14 = vector.broadcast %cst_9 : f32 to vector<1x4x2x128xf32>
    %15 = arith.maximumf %0, %14 : vector<1x4x2x128xf32>
    %16 = math.log1p %8 : vector<1x4x2x128xf32>
    %17 = arith.addf %15, %16 : vector<1x4x2x128xf32>
    %18 = arith.extui %4 : vector<1x4x2x128xi1> to vector<1x4x2x128xi32>
    %19 = arith.sitofp %18 : vector<1x4x2x128xi32> to vector<1x4x2x128xf32>
    %20 = arith.mulf %0, %19 : vector<1x4x2x128xf32>
    %21 = arith.subf %17, %20 : vector<1x4x2x128xf32>
    %cst_10 = arith.constant 0.000000e+00 : f32
    %22 = vector.broadcast %cst_10 : f32 to vector<1x4x2x128xf32>
    %23 = arith.cmpf oge, %0, %22 : vector<1x4x2x128xf32>
    %24 = arith.xori %4, %23 : vector<1x4x2x128xi1>
    %cst_11 = arith.constant dense<true> : vector<1x4x2x128xi1>
    %25 = arith.xori %24, %cst_11 : vector<1x4x2x128xi1>
    %26 = arith.select %25, %13, %12 : vector<1x4x2x128xi1>, vector<1x4x2x128xf32>
    %27 = arith.mulf %26, %26 : vector<1x4x2x128xf32>
    %28 = arith.mulf %21, %27 : vector<1x4x2x128xf32>
    %cst_12 = arith.constant 2.500000e-01 : f32
    %cst_13 = arith.constant 7.500000e-01 : f32
    %29 = vector.broadcast %cst_12 : f32 to vector<1x4x2x128xf32>
    %30 = vector.broadcast %cst_13 : f32 to vector<1x4x2x128xf32>
    %31 = arith.select %4, %29, %30 : vector<1x4x2x128xi1>, vector<1x4x2x128xf32>
    %32 = arith.mulf %28, %31 : vector<1x4x2x128xf32>
    %33 = arith.mulf %27, %26 : vector<1x4x2x128xf32>
    %cst_14 = arith.constant 1.000000e+00 : f32
    %34 = vector.broadcast %cst_14 : f32 to vector<1x4x2x128xf32>
    %35 = arith.mulf %34, %33 : vector<1x4x2x128xf32>
    %36 = arith.addf %32, %35 : vector<1x4x2x128xf32>
    %c0_15 = arith.constant 0 : index
    %c0_16 = arith.constant 0 : index
    %c0_17 = arith.constant 0 : index
    %c0_18 = arith.constant 0 : index
    %37 = vector.load %arg4[%c0_15, %c0_16, %c0_17, %c0_18] : memref<1x4x2x128xf32, #tpu.memory_space<vmem>>, vector<1x4x2x128xf32>
    tpu.vector_store %arg4[%c0_15, %c0_16, %c0_17, %c0_18], %36 {strides = array<i32>} : memref<1x4x2x128xf32, #tpu.memory_space<vmem>>, vector<1x4x2x128xf32>,
    return
  }
  func.func @transform_0(%arg0: i32, %arg1: i32) -> (i32, i32, i32, i32) {
    %c0_i32 = arith.constant 0 : i32
    %c0_i32_0 = arith.constant 0 : i32
    %c0_i32_1 = arith.constant 0 : i32
    return %arg0, %c0_i32, %arg1, %c0_i32_0 : i32, i32, i32, i32
  }
  func.func @transform_1(%arg0: i32, %arg1: i32) -> (i32, i32, i32, i32) {
    %c0_i32 = arith.constant 0 : i32
    %c0_i32_0 = arith.constant 0 : i32
    %c0_i32_1 = arith.constant 0 : i32
    return %arg0, %c0_i32, %arg1, %c0_i32_0 : i32, i32, i32, i32
  }
  func.func @transform_2(%arg0: i32, %arg1: i32) -> (i32, i32, i32, i32) {
    %c0_i32 = arith.constant 0 : i32
    %c0_i32_0 = arith.constant 0 : i32
    %c0_i32_1 = arith.constant 0 : i32
    return %arg0, %c0_i32, %arg1, %c0_i32_0 : i32, i32, i32, i32
  }
}

</mosaic_0001>

<bundles_post_ra>
// kernel: tpu_custom_call.1
= control target key start
LH: loop header
LB: loop body
LE: loop exit
PB: predicated region body
PF: predicated region fallthrough
CT: control target
= control target key end

     0   :  { %7 = vsyncpa [#allocation3], 0  ;;  %s1115_s0 = inlined_call_operand.hbm [shape: f32[2,4,2,128], index: 0, kind: input, shape index: {}]   ;;  %s1116_s1 = inlined_call_operand.hbm [shape: s32[2,1,2,128], index: 1, kind: input, shape index: {}]   ;;  %s1117_s2 = inlined_call_operand.hbm [shape: f32[2,4,2,128], index: 2, kind: output, shape index: {}]  }
   0x1   :  { %9 = vsyncpa [#allocation3 + $0x1], 0 }
   0x2   :  { %10 = vsyncpa [#allocation6], 0 }
   0x3   :  { %12 = vsyncpa [#allocation6 + $0x1], 0 }
   0x4   :  { %13 = vsyncpa [#allocation4], 0 }
   0x5   :  { %15 = vsyncpa [#allocation4 + $0x1], 0  ;;  %s777_s9 = smov 0   ;;  %s779_s10 = smov 0  }
   0x6   :  { %s781_s11 = smov 0   ;;  %s783_s12 = smov 0  }
   0x7   :  { %s785_s13 = smov 0   ;;  %s787_s14 = smov 0  }
   0x8 LB: > { %s488_s15 = sadd.s32 4294967295, %s750_s14   ;;  %s489_s16 = sadd.s32 4294967294, %s750_s14   ;;  %s750_s14 = sphi %s787_s14, %s21_s14   ;;  %s746_s13 = sphi %s785_s13, %s1148_s13   ;;  %s742_s12 = sphi %s783_s12, %s1147_s12   ;;  %s738_s11 = sphi %s781_s11, %s1146_s11   ;;  %s734_s10 = sphi %s779_s10, %s1145_s10   ;;  %s730_s9 = sphi %s777_s9, %s1144_s9  }
   0x9   : > { %s33_s17 = sadd.s32 1, %s746_s13  ;;  %s42_s18 = sadd.s32 1, %s738_s11 }
   0xa   : > { %p35_p0 = scmp.ge.s32.totalorder %s33_s17, 2  ;;  %p49_p1 = scmp.ne.s32.totalorder %s738_s11, %s734_s10 }
   0xb   : > { %p50_p2 = scmp.eq.s32.totalorder %s750_s14, 0  ;;  %p55_p3 = scmp.ne.s32.totalorder %s734_s10, %s730_s9 }
   0xc   : > { %s1150_s17 = smov (%p35_p0, %s33_s17), 0  ;;  %p56_p5 = scmp.eq.s32.totalorder %s488_s15, 0 }
   0xd   : > { %p818_p4 = por %p50_p2, %p49_p1  ;;  %s37_s20 = ssub.s32 %s746_s13, %s1150_s17 }
   0xe   : > { %p109_p6 = scmp.eq.s32.totalorder %s488_s15, 1  ;;  %p40_p7 = scmp.eq.s32.totalorder %s37_s20, 0 }
   0xf   : > { %p824_p8 = por %p56_p5, %p55_p3  ;;  %p115_p10 = scmp.eq.s32.totalorder %s489_s16, 1 }
  0x10   : > { %p828_p9 = por %p109_p6, %p49_p1  ;;  %p491_p12 = scmp.ge.s32.totalorder %s750_s14, 2 }
  0x11   : > { %s833_s23 = scalar_select %p40_p7, %s738_s11, %s42_s18  }
  0x12   : > { %p835_p11 = por %p115_p10, %p55_p3  ;;  %p529_p13 = scmp.lt.s32.totalorder %s750_s14, 2 }
  0x13   : > { %s842_s25 = sand.u32 1, %s738_s11   ;;  %s510_s27 = sshll.u32 %s746_s13, 7 }
  0x14   : > { %s492_s26 = sshll.u32 %s842_s25, 3  ;;  %s146_s30 = scalar_lea.hbm %s1115_s0, %s510_s27 }
  0x15   : > { %s139_s3 = scalar_lea.vmem [#allocation2], %s492_s26  ;;  %p851_p0 = pnand %p529_p13, %p818_p4 }
  0x16   : > { %s147_s4 = sshll.u32 %s139_s3, 4  ;;  %p497_p1 = scmp.ge.s32.totalorder %s750_s14, 1  ;;  %s148_s4 = int_to_ptr.vmem [resolvable:$true] %s147_s4 }
  0x17   : > { %s136_s6 = scalar_lea.sflag [#allocation3], %s842_s25  ;;  %p612_p2 = pneg %p851_p0 }
  0x18   : > { %s623_s7 = scalar_lea.vmem %s148_s4, 128  ;;  %s752_s8 = smov [#allocation2]  }
  0x19   : > { %p624_p3 = scmp.ne.s32.totalorder %s148_s4, %s623_s7  ;;  %s628_s15 = sshll.u32 %s752_s8, 4  ;;  %s629_s15 = int_to_ptr.vmem [resolvable:$false] %s628_s15 }
  0x1a   : > { %s630_s16 = scalar_lea.vmem %s629_s15, 256  ;;  %p631_p4 = scmp.lt.s32.totalorder %s148_s4, %s629_s15 }
  0x1b   : > { %p626_p5 = pnand %p624_p3, %p612_p2  ;;  %p632_p7 = scmp.lt.s32.totalorder %s630_s16, %s623_s7 }
  0x1d   : > { %p627_p6 = pneg %p626_p5  ;;  %p633_p10 = por %p632_p7, %p631_p4 }
  0x1f   : > { %p634_p13 = pnand %p633_p10, %p627_p6 }
  0x21   : > { %637 = shalt.err (!%p634_p13)
}
  0x22   : > { %s753_s18 = smov 32   ;;  %s754_s19 = smov 2  }
  0x23   : > { %521 = dma.hbm_to_vmem [thread:$0]  (!%p851_p0), %s146_s30, 128, %s148_s4, %s136_s6, %s753_s18, %s753_s18, %s754_s19  }
  0x24   : > { %p174_p3 = scmp.lt.s32.totalorder %s750_s14, 3  ;;  %s495_s20 = sshll.u32 %s842_s25, 1 }
  0x25   : > { %s496_s26 = sshll.u32 %s746_s13, 5  ;;  %s161_s7 = scalar_lea.vmem [#allocation5], %s495_s20 }
  0x26   : > { %p869_p5 = pnand %p497_p1, %p174_p3  ;;  %s167_s3 = scalar_lea.hbm %s1116_s1, %s496_s26 }
  0x27   : > { %s169_s8 = sshll.u32 %s161_s7, 4  ;;  %s158_s15 = scalar_lea.sflag [#allocation6], %s842_s25  ;;  %s170_s8 = int_to_ptr.vmem [resolvable:$true] %s169_s8 }
  0x28   : > { %s651_s16 = scalar_lea.vmem %s170_s8, 32  ;;  %s755_s30 = smov [#allocation5]  }
  0x29   : > { %p652_p6 = scmp.ne.s32.totalorder %s170_s8, %s651_s16  ;;  %s656_s4 = sshll.u32 %s755_s30, 4  ;;  %s657_s4 = int_to_ptr.vmem [resolvable:$false] %s656_s4 }
  0x2a   : > { %s658_s6 = scalar_lea.vmem %s657_s4, 64  ;;  %p659_p1 = scmp.lt.s32.totalorder %s170_s8, %s657_s4 }
  0x2b   : > { %p654_p4 = pnand %p652_p6, %p612_p2  ;;  %p660_p10 = scmp.lt.s32.totalorder %s658_s6, %s651_s16 }
  0x2d   : > { %p655_p7 = pneg %p654_p4  ;;  %p661_p13 = por %p660_p10, %p659_p1 }
  0x2f   : > { %p662_p3 = pnand %p661_p13, %p655_p7 }
  0x31   : > { %665 = shalt.err (!%p662_p3)
}
  0x32   : > { %524 = dma.hbm_to_vmem [thread:$0]  (!%p851_p0), %s167_s3, 32, %s170_s8, %s158_s15  }
  0x33   : > { %178 = sbr.rel (%p869_p5) target bundleno = 131 (0x83), region = 28  ;;  %s885_s25 = sand.u32 (!%p869_p5), 1, %s734_s10  }
  0x34   : > { %s498_s18 = sshll.u32 (!%p869_p5), %s885_s25, 3  ;;  %s181_s19 = scalar_lea.sflag (!%p869_p5), [#allocation3], %s885_s25 }
  0x35   : > { %s184_s20 = scalar_lea.vmem (!%p869_p5), [#allocation2], %s498_s18 }
  0x38   : > { %717 = dma.done.wait (%p824_p8), %s181_s19, 128  }
  0x39   : > { %719 = vsyncadd (%p824_p8), %s181_s19, 4294967168  ;;  %s499_s5 = sshll.u32 %s885_s25, 1  ;;  %s190_s26 = scalar_lea.sflag [#allocation6], %s885_s25 }
  0x3a   : > { %s193_s27 = scalar_lea.vmem [#allocation5], %s499_s5 }
  0x3b   : > { %721 = dma.done.wait (%p824_p8), %s190_s26, 32  }
  0x3c   : > { %723 = vsyncadd (%p824_p8), %s190_s26, 4294967264  ;;  %v901_v0 = vld [vmem:[%s184_s20] sm:$0x3]  ;;  %v903_v1 = vld [vmem:[%s184_s20 + $0x2] sm:$0x3]  ;;  %v756_v27 = vmov 0.0  }
  0x3d   : > { %v228_v2 = vand.u32 2147483647, %v901_v0  ;;  %v229_v3 = vand.u32 2147483647, %v903_v1  ;;  %v907_v5 = vld [vmem:[%s184_s20 + $0x4] sm:$0x3] }
  0x3e   : > { %v230_v8 = vand.u32 2147483647, %v907_v5  ;;  %v910_v9 = vld [vmem:[%s184_s20 + $0x6] sm:$0x3]  ;;  %v918_v21 = vld [vmem:[%s193_s27] sm:$0x3] }
  0x3f   : > { %v232_v4 = vsub.f32 0.0, %v228_v2  ;;  %v233_v6 = vsub.f32 0.0, %v229_v3  ;;  %v231_v12 = vand.u32 2147483647, %v910_v9  ;;  %vm224_vm0 = vcmp.eq.s32.totalorder %v918_v21, 0  ;;  %s218_s21 = scalar_lea.vmem [#allocation7], %s498_s18 }
  0x40   : > { %v234_v11 = vsub.f32 0.0, %v230_v8  ;;  %vm320_vm1 = vcmp.ge.f32.partialorder %v901_v0, 0.0  ;;  %vm225_vm2 = vcmp.eq.s32.totalorder %v918_v21, 1  ;;  %vm226_vm3 = vcmp.eq.s32.totalorder %v918_v21, 2  ;;  %s379_s28 = sshll.u32 %s218_s21, 4  ;;  %s511_s29 = sshll.u32 %s742_s12, 7  ;;  %s1062_s28 = int_to_ptr.vmem [resolvable:$true] %s379_s28 }
  0x41   : > { %v236_v7 = vmul.f32 1.442695, %v232_v4  ;;  %v238_v10 = vmul.f32 1.442695, %v233_v6  ;;  %v235_v14 = vsub.f32 0.0, %v231_v12  ;;  %v501_v28 = vsel %vm224_vm0, 1.0, %v756_v27  ;;  %vm324_vm4 = vmxor %vm224_vm0, %vm320_vm1  ;;  %s1067_s8 = scalar_lea.hbm %s1117_s2, %s511_s29 }
  0x42   : > { %v240_v13 = vmul.f32 1.442695, %v234_v11  ;;  %v502_v29 = vsel %vm225_vm2, 1.0, %v756_v27  ;;  %vm321_vm5 = vcmp.ge.f32.partialorder %v903_v1, 0.0  ;;  %v503_v32 = vsel %vm226_vm3, 1.0, %v756_v27  ;;  %s365_s15 = scalar_lea.sflag [#allocation4], %s885_s25 }
  0x43   : > { %586 = vpow2.f32 %v236_v7  ;;  %v242_v15 = vmul.f32 1.442695, %v235_v14  ;;  %v260_v33 = vmax.f32 %v901_v0, 0.0  ;;  %v757_v35 = vmov 0.75   ;;  %vm962_vm9 = vmxor %vm225_vm2, %vm321_vm5  ;;  %s666_s16 = scalar_lea.vmem %s1062_s28, 128  ;;  %s759_s12 = smov [#allocation7]  }
  0x44   : > { %588 = vpow2.f32 %v238_v10  ;;  %v943_v36 = vsel %vm224_vm0, 0.25, %v757_v35  ;;  %vm322_vm6 = vcmp.ge.f32.partialorder %v907_v5, 0.0  ;;  %v312_v37 = vmul.f32 %v501_v28, %v901_v0  ;;  %p667_p8 = scmp.ne.s32.totalorder %s1062_s28, %s666_s16  ;;  %s670_s30 = sshll.u32 %s759_s12, 4  ;;  %s671_s30 = int_to_ptr.vmem [resolvable:$false] %s670_s30 }
  0x45   : > { %590 = vpow2.f32 %v240_v13  ;;  %vm758_vm7 = vmmov 1   ;;  %v261_v39 = vmax.f32 %v903_v1, 0.0  ;;  %v956_v43 = vmul.f32 %v502_v29, %v903_v1  ;;  %vm975_vm10 = vmxor %vm226_vm3, %vm322_vm6  ;;  %s672_s4 = scalar_lea.vmem %s671_s30, 256  ;;  %p673_p5 = scmp.lt.s32.totalorder %s1062_s28, %s671_s30 }
  0x46   : > { %592 = vpow2.f32 %v242_v15  ;;  %vm948_vm8 = vmxor %vm324_vm4, %vm758_vm7  ;;  %v262_v45 = vmax.f32 %v907_v5, 0.0  ;;  %v968_v46 = vmul.f32 %v503_v32, %v907_v5  ;;  %vm227_vm11 = vcmp.eq.s32.totalorder %v918_v21, 3  ;;  %p668_p0 = pnand %p667_p8, %p828_p9  ;;  %p674_p6 = scmp.lt.s32.totalorder %s672_s4, %s666_s16 }
  0x47   : > { %v263_v55 = vmax.f32 %v910_v9, 0.0  ;;  %vm323_vm13 = vcmp.ge.f32.partialorder %v910_v9, 0.0  ;;  %vm990_vm14 = vmxor %vm962_vm9, %vm758_vm7  ;;  %v504_v3 = vsel %vm227_vm11, 1.0, %v756_v27  ;;  %v345_v38 = vsel %vm225_vm2, 0.25, %v757_v35 }
  0x48   : > { %vm1005_vm0 = vmxor %vm975_vm10, %vm758_vm7  ;;  %p669_p2 = pneg %p668_p0  ;;  %p675_p4 = por %p674_p6, %p673_p5 }
  0x49   : > { %vm1022_vm4 = vmxor %vm227_vm11, %vm323_vm13 }
  0x4a   : > { %vm331_vm6 = vmxor %vm1022_vm4, %vm758_vm7  ;;  %p676_p7 = pnand %p675_p4, %p669_p2 }
  0x50   : > { %v587_v16 = vpop.eup %586 }
  0x51   : > { %v913_v17 = vpop.eup %588  ;;  %v244_v18 = vadd.f32 1.0, %v587_v16  ;;  %v267_v24 = vmul.f32 -0.5, %v587_v16  ;;  %v270_v34 = vand.u32 2147483647, %v587_v16 }
  0x52   : > { %v245_v19 = vadd.f32 1.0, %v913_v17  ;;  %v916_v20 = vpop.eup %590  ;;  %v276_v26 = vmul.f32 -0.5, %v913_v17  ;;  %v279_v42 = vand.u32 2147483647, %v913_v17 }
  0x53   : > { %594 = vrcp.f32 %v244_v18  ;;  %v246_v22 = vadd.f32 1.0, %v916_v20  ;;  %v921_v23 = vpop.eup %592  ;;  %v268_v30 = vadd.f32 1.0, %v267_v24  ;;  %v285_v31 = vmul.f32 -0.5, %v916_v20 }
  0x54   : > { %596 = vlog2.f32 %v244_v18  ;;  %v247_v25 = vadd.f32 1.0, %v921_v23  ;;  %v277_v40 = vadd.f32 1.0, %v276_v26  ;;  %v294_v41 = vmul.f32 -0.5, %v921_v23 }
  0x55   : > { %598 = vrcp.f32 %v245_v19  ;;  %v269_v48 = vmul.f32 %v587_v16, %v268_v30  ;;  %v286_v49 = vadd.f32 1.0, %v285_v31  ;;  %v288_v50 = vand.u32 2147483647, %v916_v20 }
  0x56   : > { %600 = vlog2.f32 %v245_v19  ;;  %vm980_vm12 = vcmp.lt.f32.partialorder %v270_v34, 0.0004427343  ;;  %v278_v58 = vmul.f32 %v913_v17, %v277_v40  ;;  %v295_v60 = vadd.f32 1.0, %v294_v41 }
  0x57   : > { %602 = vrcp.f32 %v246_v22  ;;  %v297_v61 = vand.u32 2147483647, %v921_v23  ;;  %vm998_vm15 = vcmp.lt.f32.partialorder %v279_v42, 0.0004427343  ;;  %v287_v7 = vmul.f32 %v916_v20, %v286_v49 }
  0x58   : > { %604 = vlog2.f32 %v246_v22  ;;  %vm1014_vm1 = vcmp.lt.f32.partialorder %v288_v50, 0.0004427343  ;;  %v296_v18 = vmul.f32 %v921_v23, %v295_v60  ;;  %v315_v40 = vmul.f32 %v504_v3, %v910_v9 }
  0x59   : > { %606 = vrcp.f32 %v247_v25  ;;  %vm1032_vm5 = vcmp.lt.f32.partialorder %v297_v61, 0.0004427343 }
  0x5a   : > { %608 = vlog2.f32 %v247_v25 }
  0x60   : > { %v595_v47 = vpop.eup %594 }
  0x61   : > { %v597_v52 = vpop.eup %596  ;;  %v256_v53 = vmul.f32 %v595_v47, %v587_v16 }
  0x62   : > { %v599_v56 = vpop.eup %598  ;;  %v266_v57 = vmul.f32 0.6931472, %v597_v52 }
  0x63   : > { %v601_v62 = vpop.eup %600  ;;  %v332_v63 = vsel %vm948_vm8, %v256_v53, %v595_v47  ;;  %v257_v0 = vmul.f32 %v599_v56, %v913_v17  ;;  %v347_v53 = vsel %vm227_vm11, 0.25, %v757_v35 }
  0x64   : > { %v603_v4 = vpop.eup %602  ;;  %v272_v5 = vsel %vm980_vm12, %v269_v48, %v266_v57  ;;  %v275_v6 = vmul.f32 0.6931472, %v601_v62  ;;  %v336_v13 = vmul.f32 %v332_v63, %v332_v63 }
  0x65   : > { %v605_v11 = vpop.eup %604  ;;  %v300_v12 = vadd.f32 %v272_v5, %v260_v33  ;;  %v333_v14 = vsel %vm990_vm14, %v257_v0, %v599_v56  ;;  %v258_v15 = vmul.f32 %v603_v4, %v916_v20 }
  0x66   : > { %v281_v16 = vsel %vm998_vm15, %v278_v58, %v275_v6  ;;  %v284_v17 = vmul.f32 0.6931472, %v605_v11  ;;  %v607_v22 = vpop.eup %606  ;;  %v337_v26 = vmul.f32 %v333_v14, %v333_v14  ;;  %v352_v28 = vmul.f32 %v336_v13, %v332_v63 }
  0x67   : > { %v316_v24 = vsub.f32 %v300_v12, %v312_v37  ;;  %v301_v25 = vadd.f32 %v281_v16, %v261_v39  ;;  %v334_v27 = vsel %vm1005_vm0, %v258_v15, %v603_v4  ;;  %v609_v20 = vpop.eup %608  ;;  %v259_v31 = vmul.f32 %v607_v22, %v921_v23 }
  0x68   : > { %v290_v29 = vsel %vm1014_vm1, %v287_v7, %v284_v17  ;;  %v338_v30 = vmul.f32 %v334_v27, %v334_v27  ;;  %v293_v37 = vmul.f32 0.6931472, %v609_v20  ;;  %v353_v39 = vmul.f32 %v337_v26, %v333_v14 }
  0x69   : > { %v340_v32 = vmul.f32 %v336_v13, %v316_v24  ;;  %v317_v33 = vsub.f32 %v301_v25, %v956_v43  ;;  %v302_v34 = vadd.f32 %v290_v29, %v262_v45  ;;  %v335_v41 = vsel %vm331_vm6, %v259_v31, %v607_v22 }
  0x6a   : > { %v299_v23 = vsel %vm1032_vm5, %v296_v18, %v293_v37  ;;  %v346_v43 = vsel %vm226_vm3, 0.25, %v757_v35  ;;  %v339_v48 = vmul.f32 %v335_v41, %v335_v41  ;;  %v354_v9 = vmul.f32 %v338_v30, %v334_v27 }
  0x6b   : > { %v348_v42 = vmul.f32 %v943_v36, %v340_v32  ;;  %v341_v44 = vmul.f32 %v337_v26, %v317_v33  ;;  %v318_v47 = vsub.f32 %v302_v34, %v968_v46  ;;  %v303_v45 = vadd.f32 %v299_v23, %v263_v55 }
  0x6c   : > { %v355_v55 = vmul.f32 %v339_v48, %v335_v41 }
  0x6d   : > { %v356_v49 = vadd.f32 %v352_v28, %v348_v42  ;;  %v349_v50 = vmul.f32 %v345_v38, %v341_v44  ;;  %v342_v51 = vmul.f32 %v338_v30, %v318_v47  ;;  %v319_v52 = vsub.f32 %v303_v45, %v315_v40 }
  0x6f   : > { %360 = vst [vmem:[%s218_s21] sm:$0x3] %v356_v49  ;;  %v357_v36 = vadd.f32 %v353_v39, %v349_v50  ;;  %v350_v46 = vmul.f32 %v346_v43, %v342_v51  ;;  %v343_v54 = vmul.f32 %v339_v48, %v319_v52 }
  0x71   : > { %361 = vst [vmem:[%s218_s21 + $0x2] sm:$0x3] %v357_v36  ;;  %v358_v56 = vadd.f32 %v354_v9, %v350_v46  ;;  %v351_v57 = vmul.f32 %v347_v53, %v343_v54 }
  0x73   : > { %362 = vst [vmem:[%s218_s21 + $0x4] sm:$0x3] %v358_v56  ;;  %v359_v21 = vadd.f32 %v355_v55, %v351_v57 }
  0x75   : > { %363 = vst [vmem:[%s218_s21 + $0x6] sm:$0x3] %v359_v21 }
  0x76   : > { %679 = shalt.err (!%p676_p7)
}
  0x77   : > { %s680_s6 = scalar_lea.hbm %s1067_s8, 128  ;;  %s684_s20 = scalar_lea.hbm %s1117_s2, 256 }
  0x78   : > { %p681_p1 = scmp.ne.s32.totalorder %s1067_s8, %s680_s6  ;;  %p685_p3 = scmp.lt.s32.totalorder %s1067_s8, %s1117_s2 }
  0x79   : > { %p686_p8 = scmp.lt.s32.totalorder %s684_s20, %s680_s6 }
  0x7a   : > { %p682_p10 = pnand %p681_p1, %p828_p9 }
  0x7b   : > { %p687_p0 = por %p686_p8, %p685_p3 }
  0x7c   : > { %p683_p13 = pneg %p682_p10 }
  0x7e   : > { %p688_p2 = pnand %p687_p0, %p683_p13 }
  0x80   : > { %691 = shalt.err (!%p688_p2)
}
  0x81   : > { %s760_s27 = smov 32   ;;  %s761_s21 = smov 2  }
  0x82   : > { %516 = dma.vmem_to_hbm [thread:$0]  (%p828_p9), %s1062_s28, 128, %s1067_s8, %s365_s15, %s760_s27, %s760_s27, %s761_s21  }
  0x83 PF: > { %s394_s29 = sand.u32 1, %s730_s9   ;;  %p526_p5 = pnand %p491_p12, %p835_p11 }
  0x84   : > { %s395_s3 = scalar_lea.sflag [#allocation4], %s394_s29 }
  0x85   : > { %p527_p6 = pneg %p526_p5 }
  0x87   : > { %725 = dma.done.wait (%p527_p6), %s395_s3, 128  }
  0x88   : > { %727 = vsyncadd (%p527_p6), %s395_s3, 4294967168  ;;  %s21_s14 = sadd.s32 1, %s750_s14   ;;  %s1144_s9 = smov %s734_s10 }
  0x89   : > { %p18_p4 = scmp.ge.s32.totalorder %s21_s14, 4   ;;  %s1145_s10 = smov %s738_s11 }
  0x8a   : > { %s1146_s11 = smov %s833_s23  ;;  %s1147_s12 = smov %s746_s13 }
  0x8b   : > { %s1148_s13 = smov %s1150_s17  ;;  %20 = sbr.rel (!%p18_p4) target bundleno = 8 (0x8), region = 86 }
  0x90   :  { %400 = vsyncpa [#allocation3], 1 }
  0x91   :  { %402 = vsyncpa [#allocation3 + $0x1], 1 }
  0x92   :  { %403 = vsyncpa [#allocation6], 1 }
  0x93   :  { %405 = vsyncpa [#allocation6 + $0x1], 1 }
  0x94   :  { %406 = vsyncpa [#allocation4], 1 }
  0x95   :  { %408 = vsyncpa [#allocation4 + $0x1], 1 }

</bundles_post_ra>
